<compile_context>
chip_gen: v7x
topology: tpu7x:2x2x1
jax: 0.10.0
libtpu: 0.0.40
codegen_flags: <defaults>
</compile_context>

<pallas_src>
import jax
import jax.numpy as jnp
from jax.experimental import pallas as pl
from jax.experimental.pallas import tpu as pltpu

# ---- packed-weight layout constants -----------------------------------------
K_PAD = 16          # fc1 contraction dim padded 9 -> 16 (sublane multiple)
HIDDEN = 128
N_PAD = 128         # fc3 output dim padded 9 -> 128 (lane-dense output stores)

W1_LO, W1_HI = 0, K_PAD                         # slab rows holding w1 (16, 128)
W2_LO, W2_HI = K_PAD, K_PAD + HIDDEN            # slab rows holding w2 (128, 128)
W3_LO, W3_HI = K_PAD + HIDDEN, K_PAD + 2 * HIDDEN   # slab rows holding w3 (128, 128)
SLAB_ROWS = W3_HI                               # 272 rows total (bf16: 68 KiB)


def dqn_kernel(x_ref, w_ref, b_ref, o_ref):
    # fc1 + relu : bf16 MXU operands, f32 accumulation, f32 bias/ReLU
    x = x_ref[...].astype(jnp.bfloat16)                                   # (TM, 16)
    h1 = jnp.dot(x, w_ref[W1_LO:W1_HI, :],
                 preferred_element_type=jnp.float32) + b_ref[0:1, :]
    h1 = jnp.maximum(h1, 0.0).astype(jnp.bfloat16)
    # fc2 + relu
    h2 = jnp.dot(h1, w_ref[W2_LO:W2_HI, :],
                 preferred_element_type=jnp.float32) + b_ref[1:2, :]
    h2 = jnp.maximum(h2, 0.0).astype(jnp.bfloat16)
    # fc3 (no activation); padded output columns (9..127) stay zero
    o_ref[...] = (jnp.dot(h2, w_ref[W3_LO:W3_HI, :],
                          preferred_element_type=jnp.float32)
                  + b_ref[2:3, :]).astype(o_ref.dtype)


def pack_params(params):
    """Pack (in, out)-layout f32 params into one bf16 weight slab + one f32 bias buffer."""
    w1, b1 = params["w1"], params["b1"]          # (9,128), (1,128)
    w2, b2 = params["w2"], params["b2"]          # (128,128), (1,128)
    w3, b3 = params["w3"], params["b3"]          # (128,9), (1,9)
    in_dim, hidden = w1.shape
    out_dim = w3.shape[1]

    w1p = jnp.zeros((K_PAD, hidden), jnp.float32).at[:in_dim, :].set(w1)
    w3p = jnp.zeros((hidden, N_PAD), jnp.float32).at[:, :out_dim].set(w3)
    slab = jnp.concatenate([w1p, w2, w3p], axis=0).astype(jnp.bfloat16)   # (272, 128)

    biases = jnp.zeros((8, N_PAD), jnp.float32)
    biases = biases.at[0, :hidden].set(b1[0])
    biases = biases.at[1, :hidden].set(b2[0])
    biases = biases.at[2, :out_dim].set(b3[0])
    return slab, biases


def dqn_forward(x, slab, biases, *, tm=256, out_dim=9):
    """x: (B, 9) f32. slab: (272,128) bf16. biases: (8,128) f32. Returns (B, out_dim) f32."""
    B, in_dim = x.shape
    grid_b = -(-B // tm)                 # ceil-div
    Bp = grid_b * tm
    # Zero-pad batch to a TM multiple and K from 9 -> 16 (dead lanes stay zero).
    x_pad = jnp.zeros((Bp, K_PAD), jnp.float32).at[:B, :in_dim].set(x)

    flops = 2 * Bp * (K_PAD * HIDDEN + HIDDEN * HIDDEN + HIDDEN * N_PAD)
    bytes_accessed = x_pad.size * 4 + slab.size * 2 + biases.size * 4 + Bp * N_PAD * 4

    out = pl.pallas_call(
        dqn_kernel,
        out_shape=jax.ShapeDtypeStruct((Bp, N_PAD), jnp.float32),
        grid=(grid_b,),
        in_specs=[
            pl.BlockSpec((tm, K_PAD), lambda i: (i, 0)),           # x tile marches over batch
            pl.BlockSpec((SLAB_ROWS, HIDDEN), lambda i: (0, 0)),   # weights stay VMEM-resident
            pl.BlockSpec((8, N_PAD), lambda i: (0, 0)),            # biases stay VMEM-resident
        ],
        out_specs=pl.BlockSpec((tm, N_PAD), lambda i: (i, 0)),     # lane-dense (TM,128) stores
        compiler_params=pltpu.CompilerParams(
            dimension_semantics=("parallel",)),                    # megacore split on v7x
        cost_estimate=pl.CostEstimate(flops=flops, transcendentals=0,
                                      bytes_accessed=bytes_accessed),
    )(x_pad, slab, biases)
    return out[:B, :out_dim]


def init_dqn_params(key, input_dim=9, hidden=128, output_dim=9):
    """PyTorch nn.Linear default init: U[-1/sqrt(fan_in), 1/sqrt(fan_in)], (in,out) layout."""
    ks = jax.random.split(key, 6)

    def linear(kw, kb, fan_in, fan_out):
        bound = 1.0 / jnp.sqrt(fan_in)
        w = jax.random.uniform(kw, (fan_in, fan_out), jnp.float32, -bound, bound)
        b = jax.random.uniform(kb, (1, fan_out), jnp.float32, -bound, bound)
        return w, b

    w1, b1 = linear(ks[0], ks[1], input_dim, hidden)
    w2, b2 = linear(ks[2], ks[3], hidden, hidden)
    w3, b3 = linear(ks[4], ks[5], hidden, output_dim)
    return {"w1": w1, "b1": b1, "w2": w2, "b2": b2, "w3": w3, "b3": b3}


def dqn_reference(x, p):
    """Pure-JAX reference doing the same bf16-operand / f32-accumulation math."""
    w1 = p["w1"].astype(jnp.bfloat16)
    w2 = p["w2"].astype(jnp.bfloat16)
    w3 = p["w3"].astype(jnp.bfloat16)
    h1 = jnp.maximum(jnp.dot(x.astype(jnp.bfloat16), w1,
                             preferred_element_type=jnp.float32) + p["b1"], 0.0)
    h2 = jnp.maximum(jnp.dot(h1.astype(jnp.bfloat16), w2,
                             preferred_element_type=jnp.float32) + p["b2"], 0.0)
    return jnp.dot(h2.astype(jnp.bfloat16), w3,
                   preferred_element_type=jnp.float32) + p["b3"]


if __name__ == "__main__":
    key = jax.random.PRNGKey(0)
    k_params, k_x = jax.random.split(key)

    INPUT_DIM, HIDDEN_DIM, OUTPUT_DIM, BATCH, TM = 9, 128, 9, 512, 256
    params = init_dqn_params(k_params, INPUT_DIM, HIDDEN_DIM, OUTPUT_DIM)
    x = jax.random.normal(k_x, (BATCH, INPUT_DIM), dtype=jnp.float32)

    slab, biases = pack_params(params)
    out = dqn_forward(x, slab, biases, tm=TM, out_dim=OUTPUT_DIM)
    out = jax.block_until_ready(out)

    # correctness check against a bf16-matched pure-JAX reference
    ref = dqn_reference(x, params)
    assert out.shape == (BATCH, OUTPUT_DIM)
    assert jnp.allclose(out, ref, atol=5e-3, rtol=5e-3), "mismatch vs reference"

    print("KERNEL_OK")
</pallas_src>

<mosaic_0001>
module attributes {stable_mosaic.version = 11 : i64} {
  func.func @dqn_kernel(%arg0: i32, %arg1: memref<256x16xf32, #tpu.memory_space<vmem>>, %arg2: memref<272x128xbf16, #tpu.memory_space<vmem>>, %arg3: memref<8x128xf32, #tpu.memory_space<vmem>>, %arg4: memref<256x128xf32, #tpu.memory_space<vmem>>) attributes {dimension_semantics = [#tpu.dimension_semantics<parallel>], iteration_bounds = array<i64: 2>, scalar_prefetch = 0 : i64, scratch_operands = 0 : i64, tpu.core_type = #tpu.core_type<tc>, window_params = [{transform_indices = @transform_0, window_bounds = array<i64: 256, 16>}, {pipeline_mode = #tpu.pipeline_mode<synchronous>, transform_indices = @transform_1, window_bounds = array<i64: 272, 128>}, {pipeline_mode = #tpu.pipeline_mode<synchronous>, transform_indices = @transform_2, window_bounds = array<i64: 8, 128>}, {transform_indices = @transform_3, window_bounds = array<i64: 256, 128>}]} {
    %c0 = arith.constant 0 : index
    %c0_0 = arith.constant 0 : index
    %0 = vector.load %arg1[%c0, %c0_0] : memref<256x16xf32, #tpu.memory_space<vmem>>, vector<256x16xf32>
    %1 = arith.truncf %0 : vector<256x16xf32> to vector<256x16xbf16>
    %c0_1 = arith.constant 0 : index
    %c0_2 = arith.constant 0 : index
    %2 = vector.load %arg2[%c0_1, %c0_2] : memref<272x128xbf16, #tpu.memory_space<vmem>>, vector<16x128xbf16>
    %cst = arith.constant dense<0.000000e+00> : vector<256x128xf32>
    %3 = tpu.matmul %1, %2, %cst {dimension_numbers = #tpu.dot_dimension_numbers<[1], [0], [0], [1], [0, 0, 1, 1], [], []>} : vector<256x16xbf16>, vector<16x128xbf16>, vector<256x128xf32> -> vector<256x128xf32>
    %c0_3 = arith.constant 0 : index
    %c0_4 = arith.constant 0 : index
    %4 = vector.load %arg3[%c0_3, %c0_4] : memref<8x128xf32, #tpu.memory_space<vmem>>, vector<1x128xf32>
    %5 = vector.broadcast %4 : vector<1x128xf32> to vector<256x128xf32>
    %6 = arith.addf %3, %5 : vector<256x128xf32>
    %cst_5 = arith.constant 0.000000e+00 : f32
    %7 = vector.broadcast %cst_5 : f32 to vector<256x128xf32>
    %8 = arith.maximumf %6, %7 : vector<256x128xf32>
    %9 = arith.truncf %8 : vector<256x128xf32> to vector<256x128xbf16>
    %c16 = arith.constant 16 : index
    %c0_6 = arith.constant 0 : index
    %10 = vector.load %arg2[%c16, %c0_6] : memref<272x128xbf16, #tpu.memory_space<vmem>>, vector<128x128xbf16>
    %cst_7 = arith.constant dense<0.000000e+00> : vector<256x128xf32>
    %11 = tpu.matmul %9, %10, %cst_7 {dimension_numbers = #tpu.dot_dimension_numbers<[1], [0], [0], [1], [0, 0, 1, 1], [], []>} : vector<256x128xbf16>, vector<128x128xbf16>, vector<256x128xf32> -> vector<256x128xf32>
    %c1 = arith.constant 1 : index
    %c0_8 = arith.constant 0 : index
    %12 = vector.load %arg3[%c1, %c0_8] : memref<8x128xf32, #tpu.memory_space<vmem>>, vector<1x128xf32>
    %13 = vector.broadcast %12 : vector<1x128xf32> to vector<256x128xf32>
    %14 = arith.addf %11, %13 : vector<256x128xf32>
    %cst_9 = arith.constant 0.000000e+00 : f32
    %15 = vector.broadcast %cst_9 : f32 to vector<256x128xf32>
    %16 = arith.maximumf %14, %15 : vector<256x128xf32>
    %17 = arith.truncf %16 : vector<256x128xf32> to vector<256x128xbf16>
    %c144 = arith.constant 144 : index
    %c0_10 = arith.constant 0 : index
    %18 = vector.load %arg2[%c144, %c0_10] : memref<272x128xbf16, #tpu.memory_space<vmem>>, vector<128x128xbf16>
    %cst_11 = arith.constant dense<0.000000e+00> : vector<256x128xf32>
    %19 = tpu.matmul %17, %18, %cst_11 {dimension_numbers = #tpu.dot_dimension_numbers<[1], [0], [0], [1], [0, 0, 1, 1], [], []>} : vector<256x128xbf16>, vector<128x128xbf16>, vector<256x128xf32> -> vector<256x128xf32>
    %c2 = arith.constant 2 : index
    %c0_12 = arith.constant 0 : index
    %20 = vector.load %arg3[%c2, %c0_12] : memref<8x128xf32, #tpu.memory_space<vmem>>, vector<1x128xf32>
    %21 = vector.broadcast %20 : vector<1x128xf32> to vector<256x128xf32>
    %22 = arith.addf %19, %21 : vector<256x128xf32>
    %c0_13 = arith.constant 0 : index
    %c0_14 = arith.constant 0 : index
    %23 = vector.load %arg4[%c0_13, %c0_14] : memref<256x128xf32, #tpu.memory_space<vmem>>, vector<256x128xf32>
    tpu.vector_store %arg4[%c0_13, %c0_14], %22 {strides = array<i32>} : memref<256x128xf32, #tpu.memory_space<vmem>>, vector<256x128xf32>,
    return
  }
  func.func @transform_0(%arg0: i32) -> (i32, i32) {
    %c0_i32 = arith.constant 0 : i32
    %c0_i32_0 = arith.constant 0 : i32
    return %arg0, %c0_i32 : i32, i32
  }
  func.func @transform_1(%arg0: i32) -> (i32, i32) {
    %c0_i32 = arith.constant 0 : i32
    %c0_i32_0 = arith.constant 0 : i32
    %c0_i32_1 = arith.constant 0 : i32
    return %c0_i32, %c0_i32_0 : i32, i32
  }
  func.func @transform_2(%arg0: i32) -> (i32, i32) {
    %c0_i32 = arith.constant 0 : i32
    %c0_i32_0 = arith.constant 0 : i32
    %c0_i32_1 = arith.constant 0 : i32
    return %c0_i32, %c0_i32_0 : i32, i32
  }
  func.func @transform_3(%arg0: i32) -> (i32, i32) {
    %c0_i32 = arith.constant 0 : i32
    %c0_i32_0 = arith.constant 0 : i32
    return %arg0, %c0_i32 : i32, i32
  }
}

</mosaic_0001>

<bundles_post_ra>
// kernel: tpu_custom_call.1
= control target key start
LH: loop header
LB: loop body
LE: loop exit
PB: predicated region body
PF: predicated region fallthrough
CT: control target
= control target key end

     0   :  { %8 = vsyncpa [#allocation3], 0  ;;  %s1858_s0 = inlined_call_operand.vmem [shape: f32[512,16], index: 0, kind: input, shape index: {}]   ;;  %s1859_s1 = inlined_call_operand.vmem [shape: bf16[272,128], index: 1, kind: input, shape index: {}]   ;;  %s1860_s2 = inlined_call_operand.vmem [shape: f32[8,128], index: 2, kind: input, shape index: {}]   ;;  %s1861_s3 = inlined_call_operand.hbm [shape: f32[512,128], index: 3, kind: output, shape index: {}]  }
   0x1   :  { %10 = vsyncpa [#allocation3 + $0x1], 0  ;;  %s1499_s12 = smov 0   ;;  %s1501_s13 = smov 0  }
   0x2   :  { %s1503_s14 = smov 0   ;;  %s1505_s15 = smov 0  }
   0x3 LB: > { %s1520_s16 = sadd.s32 4294967295, %s1474_s15   ;;  %s1108_s17 = sadd.s32 4294967294, %s1474_s15   ;;  %s1474_s15 = sphi %s1505_s15, %s1867_s15   ;;  %s1470_s14 = sphi %s1503_s14, %s1866_s14   ;;  %s1466_s13 = sphi %s1501_s13, %s1865_s13   ;;  %s1462_s12 = sphi %s1499_s12, %s1864_s12  }
   0x4   : > { %s1524_s18 = sadd.s32 1, %s1474_s15   ;;  %s91_s19 = sadd.s32 1, %s1470_s14 }
   0x5   : > { %s88_s20 = ssub.s32 %s1474_s15, %s1524_s18  ;;  %p101_p0 = scmp.ne.s32.totalorder %s1470_s14, %s1466_s13 }
   0x6   : > { %p89_p1 = scmp.eq.s32.totalorder %s88_s20, 0  ;;  %p102_p2 = scmp.eq.s32.totalorder %s1520_s16, 1 }
   0x7   : > { %p107_p3 = scmp.ne.s32.totalorder %s1466_s13, %s1462_s12  ;;  %p108_p4 = scmp.eq.s32.totalorder %s1108_s17, 1 }
   0x8   : > { %s1535_s21 = scalar_select %p89_p1, %s1470_s14, %s91_s19  }
   0x9   : > { %p1537_p5 = por %p102_p2, %p101_p0  ;;  %p1541_p6 = por %p108_p4, %p107_p3 }
   0xa   : > { %p1111_p7 = scmp.ge.s32.totalorder %s1474_s15, 1  ;;  %p141_p8 = scmp.lt.s32.totalorder %s1474_s15, 3 }
   0xc   : > { %p142_p9 = pnand %p1111_p7, %p141_p8 }
   0xd   : > { %v1395_v0 = vld [vmem:[%s1859_s1] sm:$0xff] (!%p142_p9)   ;;  %s1113_s26 = sshll.u32 (!%p142_p9), %s1520_s16, 5  ;;  %v1396_v1 = vld [vmem:[%s1859_s1 + $0x8] sm:$0xff] (!%p142_p9)   ;;  %vm234_vm0 = vcmask (!%p142_p9), 130048   ;;  %v1397_v23 = vld [vmem:[%s1859_s1 + $0x10] sm:$0xff] (!%p142_p9)   ;;  %s162_s4 = sand.u32 (!%p142_p9), 1, %s1466_s13  }
   0xe   : > { %145 = sbr.rel (%p142_p9) target bundleno = 760 (0x2f8), region = 32  ;;  %p166_p10 = scmp.lt.s32.totalorder (!%p142_p9), %s1113_s26, 63  ;;  %1222 = vmatprep.subr.bf16.mxu0 (!%p142_p9), %v1395_v0  ;;  %1352 = vmatprep.subr.bf16.mxu1 (!%p142_p9), %v1395_v0  ;;  %v1398_v28 = vld [vmem:[%s1859_s1 + $0x18] sm:$0xff] (!%p142_p9)   ;;  %v1399_v37 = vld [vmem:[%s1859_s1 + $0x20] sm:$0xff] (!%p142_p9)   ;;  %v1400_v45 = vld [vmem:[%s1859_s1 + $0x28] sm:$0xff] (!%p142_p9)  }
   0xf   : > { %1223 = vmatpush3.bf16.msra.mxu0 (!%p142_p9), %v1395_v0  ;;  %1353 = vmatpush3.bf16.msra.mxu1 (!%p142_p9), %v1395_v0  ;;  %v1401_v50 = vld [vmem:[%s1859_s1 + $0x30] sm:$0xff] (!%p142_p9)   ;;  %v1402_v55 = vld [vmem:[%s1859_s1 + $0x38] sm:$0xff] (!%p142_p9)   ;;  %v1403_v56 = vld [vmem:[%s1859_s1 + $0x40] sm:$0xff] (!%p142_p9)   ;;  %s1156_s9 = sshll.u32 (!%p142_p9), %s1520_s16, 12  ;;  %s1817_s16 = scalar_lea.sflag (!%p142_p9), [#allocation3], %s162_s4 }
  0x10   : > { %1256 = vmatprep.subr.bf16.mxu1 (!%p142_p9), %v1396_v1  ;;  %v1404_v57 = vld [vmem:[%s1859_s1 + $0x48] sm:$0xff] (!%p142_p9)   ;;  %v1405_v58 = vld [vmem:[%s1859_s1 + $0x50] sm:$0xff] (!%p142_p9)   ;;  %v1406_v59 = vld [vmem:[%s1859_s1 + $0x58] sm:$0xff] (!%p142_p9)   ;;  %s1807_s19 = scalar_lea.hbm (!%p142_p9), %s1861_s3, %s1156_s9  ;;  %s1476_s24 = smov (!%p142_p9), [#allocation2]  }
  0x11   : > { %1304 = vmatprep.subr.bf16.mxu0 (!%p142_p9), %v1404_v57  ;;  %v1407_v60 = vld [vmem:[%s1859_s1 + $0x60] sm:$0xff] (!%p142_p9)   ;;  %v1408_v61 = vld [vmem:[%s1859_s1 + $0x68] sm:$0xff] (!%p142_p9)   ;;  %v1409_v62 = vld [vmem:[%s1859_s1 + $0x70] sm:$0xff] (!%p142_p9)   ;;  %s1416_s25 = sshll.u32 (!%p142_p9), %s1476_s24, 4  ;;  %s1417_s25 = int_to_ptr.vmem [resolvable:$false] %s1416_s25 }
  0x12   : > { %v1649_v63 = vld [vmem:[%s1860_s2] ss:$0 sm:$0xff] (!%p142_p9) }
  0x15   : > { %s1869_s26 = smov (!%p166_p10, %s1113_s26), 63 }
  0x16   : > { %s1114_s29 = sshll.u32 %s1869_s26, 3  ;;  %s1418_s26 = scalar_lea.vmem %s1417_s25, 8192 }
  0x17   : > { %s1557_s5 = scalar_lea.vmem %s1858_s0, %s1114_s29 }
  0x18   : > { %v173_v2 = vld [vmem:[%s1557_s5] sm:$0xff]  ;;  %v174_v3 = vld [vmem:[%s1557_s5 + $0x8] sm:$0xff]  ;;  %v175_v4 = vld [vmem:[%s1557_s5 + $0x10] sm:$0xff] }
  0x19   : > { %v205_v5 = vpack.c.bf16 %v174_v3, %v173_v2  ;;  %v176_v6 = vld [vmem:[%s1557_s5 + $0x18] sm:$0xff]  ;;  %v177_v7 = vld [vmem:[%s1557_s5 + $0x20] sm:$0xff]  ;;  %v178_v8 = vld [vmem:[%s1557_s5 + $0x28] sm:$0xff] }
  0x1a   : > { %v206_v9 = vpack.c.bf16 %v176_v6, %v175_v4  ;;  %v207_v10 = vpack.c.bf16 %v178_v8, %v177_v7  ;;  %v179_v11 = vld [vmem:[%s1557_s5 + $0x30] sm:$0xff]  ;;  %v180_v12 = vld [vmem:[%s1557_s5 + $0x38] sm:$0xff]  ;;  %v181_v13 = vld [vmem:[%s1557_s5 + $0x40] sm:$0xff] }
  0x1b   : > { %1224 = vmatprep.mubr.msk.bf16.mxu0 %vm234_vm0, %v205_v5  ;;  %v182_v14 = vld [vmem:[%s1557_s5 + $0x48] sm:$0xff]  ;;  %v189_v15 = vld [vmem:[%s1557_s5 + $0x80] sm:$0xff]  ;;  %v191_v18 = vld [vmem:[%s1557_s5 + $0x90] sm:$0xff]  ;;  %v208_v24 = vpack.c.bf16 %v180_v12, %v179_v11 }
  0x1c   : > { %1225 = vmatmul.mubr.msk.bf16.vlgmr.msra.gmra.mrb[0].mxu0 %vm234_vm0, %v206_v9  ;;  %v190_v16 = vld [vmem:[%s1557_s5 + $0x88] sm:$0xff]  ;;  %v192_v19 = vld [vmem:[%s1557_s5 + $0x98] sm:$0xff]  ;;  %v193_v20 = vld [vmem:[%s1557_s5 + $0xa0] sm:$0xff]  ;;  %v209_v26 = vpack.c.bf16 %v182_v14, %v181_v13 }
  0x1d   : > { %1228 = vmatprep.mubr.msk.bf16.mxu0 %vm234_vm0, %v207_v10  ;;  %v213_v17 = vpack.c.bf16 %v190_v16, %v189_v15  ;;  %v214_v21 = vpack.c.bf16 %v192_v19, %v191_v18  ;;  %v194_v22 = vld [vmem:[%s1557_s5 + $0xa8] sm:$0xff]  ;;  %v195_v27 = vld [vmem:[%s1557_s5 + $0xb0] sm:$0xff]  ;;  %v196_v29 = vld [vmem:[%s1557_s5 + $0xb8] sm:$0xff]  ;;  %1305 = vmatpush3.bf16.msra.mxu0 %v1404_v57 }
  0x1e   : > { %v215_v25 = vpack.c.bf16 %v194_v22, %v193_v20  ;;  %v197_v30 = vld [vmem:[%s1557_s5 + $0xc0] sm:$0xff]  ;;  %v198_v31 = vld [vmem:[%s1557_s5 + $0xc8] sm:$0xff]  ;;  %v183_v32 = vld [vmem:[%s1557_s5 + $0x50] sm:$0xff]  ;;  %v216_v36 = vpack.c.bf16 %v196_v29, %v195_v27  ;;  %1306 = vmatprep.subr.bf16.mxu0 %v1405_v58 }
  0x1f   : > { %1240 = vmatprep.mubr.msk.bf16.mxu1 %vm234_vm0, %v213_v17  ;;  %v184_v33 = vld [vmem:[%s1557_s5 + $0x58] sm:$0xff]  ;;  %v185_v34 = vld [vmem:[%s1557_s5 + $0x60] sm:$0xff]  ;;  %v186_v35 = vld [vmem:[%s1557_s5 + $0x68] sm:$0xff]  ;;  %v217_v38 = vpack.c.bf16 %v198_v31, %v197_v30 }
  0x20   : > { %1241 = vmatmul.mubr.msk.bf16.vlgmr.msra.gmra.mrb[0].mxu1 %vm234_vm0, %v214_v21  ;;  %v210_v39 = vpack.c.bf16 %v184_v33, %v183_v32  ;;  %v211_v40 = vpack.c.bf16 %v186_v35, %v185_v34  ;;  %v199_v41 = vld [vmem:[%s1557_s5 + $0xd0] sm:$0xff]  ;;  %v200_v42 = vld [vmem:[%s1557_s5 + $0xd8] sm:$0xff]  ;;  %v201_v43 = vld [vmem:[%s1557_s5 + $0xe0] sm:$0xff] }
  0x21   : > { %1244 = vmatprep.mubr.msk.bf16.mxu1 %vm234_vm0, %v215_v25  ;;  %1257 = vmatpush3.bf16.msra.mxu1 %v1396_v1  ;;  %v202_v44 = vld [vmem:[%s1557_s5 + $0xe8] sm:$0xff]  ;;  %v187_v46 = vld [vmem:[%s1557_s5 + $0x70] sm:$0xff]  ;;  %v188_v47 = vld [vmem:[%s1557_s5 + $0x78] sm:$0xff]  ;;  %v218_v48 = vpack.c.bf16 %v200_v42, %v199_v41 }
  0x22   : > { %1258 = vmatprep.subr.bf16.mxu1 %v1397_v23  ;;  %v219_v49 = vpack.c.bf16 %v202_v44, %v201_v43  ;;  %v212_v51 = vpack.c.bf16 %v188_v47, %v187_v46  ;;  %v203_v52 = vld [vmem:[%s1557_s5 + $0xf0] sm:$0xff]  ;;  %v204_v53 = vld [vmem:[%s1557_s5 + $0xf8] sm:$0xff]  ;;  %1307 = vmatpush3.bf16.msra.mxu0 %v1405_v58  ;;  %s1112_s5 = sshll.u32 %s162_s4, 8 }
  0x23   : > { %v220_v54 = vpack.c.bf16 %v204_v53, %v203_v52  ;;  %1308 = vmatprep.subr.bf16.mxu0 %v1406_v59  ;;  %s1742_s8 = scalar_lea.vmem [#allocation2], %s1112_s5 }
  0x24   : > { %1229 = vmatmul.mubr.msk.bf16.gmra.mrb[4].mxu0 %vm234_vm0, %v208_v24  ;;  %s1046_s10 = sshll.u32 %s1742_s8, 4  ;;  %s1809_s10 = int_to_ptr.vmem [resolvable:$true] %s1046_s10 }
  0x25   : > { %1232 = vmatprep.mubr.msk.bf16.mxu0 %vm234_vm0, %v209_v26  ;;  %1259 = vmatpush3.bf16.msra.mxu1 %v1397_v23  ;;  %s1412_s20 = scalar_lea.vmem %s1809_s10, 4096  ;;  %p1419_p0 = scmp.lt.s32.totalorder %s1809_s10, %s1417_s25 }
  0x26   : > { %1260 = vmatprep.subr.bf16.mxu1 %v1398_v28  ;;  %1309 = vmatpush3.bf16.msra.mxu0 %v1406_v59  ;;  %p1413_p11 = scmp.ne.s32.totalorder %s1809_s10, %s1412_s20  ;;  %p1420_p1 = scmp.lt.s32.totalorder %s1418_s26, %s1412_s20 }
  0x27   : > { %1310 = vmatprep.subr.bf16.mxu0 %v1407_v60 }
  0x28   : > { %1245 = vmatmul.mubr.msk.bf16.gmra.mrb[4].mxu1 %vm234_vm0, %v216_v36  ;;  %p1414_p12 = pnand %p1413_p11, %p1537_p5  ;;  %p1421_p2 = por %p1420_p1, %p1419_p0 }
  0x29   : > { %1248 = vmatprep.mubr.msk.bf16.mxu1 %vm234_vm0, %v217_v38  ;;  %1261 = vmatpush3.bf16.msra.mxu1 %v1398_v28 }
  0x2a   : > { %1262 = vmatprep.subr.bf16.mxu1 %v1399_v37  ;;  %1311 = vmatpush3.bf16.msra.mxu0 %v1407_v60  ;;  %p1415_p13 = pneg %p1414_p12 }
  0x2b   : > { %1312 = vmatprep.subr.bf16.mxu0 %v1408_v61 }
  0x2c   : > { %1233 = vmatmul.mubr.msk.bf16.gmra.mrb[8].mxu0 %vm234_vm0, %v210_v39  ;;  %p1422_p3 = pnand %p1421_p2, %p1415_p13 }
  0x2d   : > { %1236 = vmatprep.mubr.msk.bf16.mxu0 %vm234_vm0, %v211_v40  ;;  %1263 = vmatpush3.bf16.msra.mxu1 %v1399_v37 }
  0x2e   : > { %1264 = vmatprep.subr.bf16.mxu1 %v1400_v45  ;;  %1313 = vmatpush3.bf16.msra.mxu0 %v1408_v61 }
  0x2f   : > { %1314 = vmatprep.subr.bf16.mxu0 %v1409_v62 }
  0x30   : > { %1249 = vmatmul.mubr.msk.bf16.gmra.mrb[8].mxu1 %vm234_vm0, %v218_v48 }
  0x31   : > { %1252 = vmatprep.mubr.msk.bf16.mxu1 %vm234_vm0, %v219_v49  ;;  %1265 = vmatpush3.bf16.msra.mxu1 %v1400_v45 }
  0x32   : > { %1266 = vmatprep.subr.bf16.mxu1 %v1401_v50  ;;  %1315 = vmatpush3.bf16.msra.mxu0 %v1409_v62 }
  0x34   : > { %1237 = vmatmul.mubr.msk.bf16.gmra.mrb[12].mxu0 %vm234_vm0, %v212_v51 }
  0x35   : > { %1267 = vmatpush3.bf16.msra.mxu1 %v1401_v50 }
  0x36   : > { %1268 = vmatprep.subr.bf16.mxu1 %v1402_v55 }
  0x38   : > { %1253 = vmatmul.mubr.msk.bf16.gmra.mrb[12].mxu1 %vm234_vm0, %v220_v54 }
  0x39   : > { %1269 = vmatpush3.bf16.msra.mxu1 %v1402_v55 }
  0x3a   : > { %1270 = vmatprep.subr.bf16.mxu1 %v1403_v56 }
  0x3d   : > { %1271 = vmatpush3.bf16.msra.mxu1 %v1403_v56 }
  0xef   : > { %v1226_v0 = vpop.f32.mrb[0].mxu0 }
  0xf0   : > { %v326_v1 = vadd.f32 %v1226_v0, %v1649_v63  ;;  %v317_v2 = vpop.f32.mrb[1].mxu0 }
  0xf1   : > { %v318_v3 = vadd.f32 %v1649_v63, %v317_v2  ;;  %v1227_v4 = vpop.f32.mrb[2].mxu0 }
  0xf2   : > { %v329_v5 = vadd.f32 %v1227_v4, %v1649_v63  ;;  %v320_v6 = vpop.f32.mrb[3].mxu0  ;;  %v446_v8 = vmax.f32 %v326_v1, 0.0 }
  0xf3   : > { %v321_v7 = vadd.f32 %v1649_v63, %v320_v6  ;;  %v1242_v10 = vpop.f32.mrb[0].mxu1  ;;  %v444_v11 = vmax.f32 %v318_v3, 0.0 }
  0xf4   : > { %v447_v9 = vmax.f32 %v329_v5, 0.0  ;;  %v390_v13 = vadd.f32 %v1242_v10, %v1649_v63  ;;  %v381_v14 = vpop.f32.mrb[1].mxu1 }
  0xf5   : > { %v445_v12 = vmax.f32 %v321_v7, 0.0  ;;  %v382_v16 = vadd.f32 %v1649_v63, %v381_v14  ;;  %v1243_v17 = vpop.f32.mrb[2].mxu1 }
  0xf6   : > { %v477_v15 = vpack.c.bf16 %v447_v9, %v446_v8  ;;  %v462_v20 = vmax.f32 %v390_v13, 0.0  ;;  %v393_v21 = vadd.f32 %v1243_v17, %v1649_v63  ;;  %v384_v22 = vpop.f32.mrb[3].mxu1 }
  0xf7   : > { %v476_v18 = vpack.c.bf16 %v445_v12, %v444_v11  ;;  %v1230_v19 = vpop.f32.mrb[4].mxu0  ;;  %v460_v25 = vmax.f32 %v382_v16, 0.0  ;;  %v385_v26 = vadd.f32 %v1649_v63, %v384_v22 }
  0xf8   : > { %v342_v23 = vadd.f32 %v1230_v19, %v1649_v63  ;;  %v333_v24 = vpop.f32.mrb[5].mxu0  ;;  %v463_v29 = vmax.f32 %v393_v21, 0.0 }
  0xf9   : > { %v334_v27 = vadd.f32 %v1649_v63, %v333_v24  ;;  %v1231_v28 = vpop.f32.mrb[6].mxu0  ;;  %1272 = vmatprep.mubr.bf16.mxu1 %v476_v18  ;;  %v461_v32 = vmax.f32 %v385_v26, 0.0 }
  0xfa   : > { %v345_v30 = vadd.f32 %v1231_v28, %v1649_v63  ;;  %v336_v31 = vpop.f32.mrb[7].mxu0  ;;  %1273 = vmatmul.mubr.bf16.vlgmr.msra.gmra.mrb[16].mxu1 %v477_v15  ;;  %v1663_v34 = vpack.c.bf16 %v463_v29, %v462_v20  ;;  %v450_v35 = vmax.f32 %v342_v23, 0.0 }
  0xfb   : > { %v337_v33 = vadd.f32 %v1649_v63, %v336_v31  ;;  %v1665_v37 = vpack.c.bf16 %v461_v32, %v460_v25  ;;  %v1246_v38 = vpop.f32.mrb[4].mxu1  ;;  %v448_v39 = vmax.f32 %v334_v27, 0.0 }
  0xfc   : > { %v451_v36 = vmax.f32 %v345_v30, 0.0  ;;  %v406_v41 = vadd.f32 %v1246_v38, %v1649_v63  ;;  %v397_v42 = vpop.f32.mrb[5].mxu1 }
  0xfd   : > { %v449_v40 = vmax.f32 %v337_v33, 0.0  ;;  %v398_v44 = vadd.f32 %v1649_v63, %v397_v42  ;;  %v1247_v45 = vpop.f32.mrb[6].mxu1 }
  0xfe   : > { %v479_v43 = vpack.c.bf16 %v451_v36, %v450_v35  ;;  %v466_v48 = vmax.f32 %v406_v41, 0.0  ;;  %v409_v49 = vadd.f32 %v1247_v45, %v1649_v63  ;;  %v400_v50 = vpop.f32.mrb[7].mxu1 }
  0xff   : > { %v478_v46 = vpack.c.bf16 %v449_v40, %v448_v39  ;;  %v1234_v47 = vpop.f32.mrb[8].mxu0  ;;  %v464_v53 = vmax.f32 %v398_v44, 0.0  ;;  %v401_v54 = vadd.f32 %v1649_v63, %v400_v50 }
 0x100   : > { %v358_v51 = vadd.f32 %v1234_v47, %v1649_v63  ;;  %v349_v52 = vpop.f32.mrb[9].mxu0  ;;  %v467_v57 = vmax.f32 %v409_v49, 0.0 }
 0x101   : > { %v350_v55 = vadd.f32 %v1649_v63, %v349_v52  ;;  %v1235_v56 = vpop.f32.mrb[10].mxu0  ;;  %1276 = vmatprep.mubr.bf16.mxu1 %v478_v46  ;;  %v465_v60 = vmax.f32 %v401_v54, 0.0 }
 0x102   : > { %v361_v58 = vadd.f32 %v1235_v56, %v1649_v63  ;;  %v352_v59 = vpop.f32.mrb[11].mxu0  ;;  %1277 = vmatmul.mubr.bf16.gmra.mrb[20].mxu1 %v479_v43  ;;  %v487_v62 = vpack.c.bf16 %v467_v57, %v466_v48  ;;  %v454_v0 = vmax.f32 %v358_v51, 0.0 }
 0x103   : > { %v353_v61 = vadd.f32 %v1649_v63, %v352_v59  ;;  %v486_v2 = vpack.c.bf16 %v465_v60, %v464_v53  ;;  %v1250_v3 = vpop.f32.mrb[8].mxu1  ;;  %v452_v4 = vmax.f32 %v350_v55, 0.0 }
 0x104   : > { %v455_v1 = vmax.f32 %v361_v58, 0.0  ;;  %v422_v6 = vadd.f32 %v1250_v3, %v1649_v63  ;;  %v413_v7 = vpop.f32.mrb[9].mxu1 }
 0x105   : > { %v453_v5 = vmax.f32 %v353_v61, 0.0  ;;  %v414_v9 = vadd.f32 %v1649_v63, %v413_v7  ;;  %v1251_v10 = vpop.f32.mrb[10].mxu1 }
 0x106   : > { %v481_v8 = vpack.c.bf16 %v455_v1, %v454_v0  ;;  %v470_v13 = vmax.f32 %v422_v6, 0.0  ;;  %v425_v14 = vadd.f32 %v1251_v10, %v1649_v63  ;;  %v416_v15 = vpop.f32.mrb[11].mxu1 }
 0x107   : > { %v480_v11 = vpack.c.bf16 %v453_v5, %v452_v4  ;;  %v1238_v12 = vpop.f32.mrb[12].mxu0  ;;  %v468_v18 = vmax.f32 %v414_v9, 0.0  ;;  %v417_v19 = vadd.f32 %v1649_v63, %v416_v15 }
 0x108   : > { %v374_v16 = vadd.f32 %v1238_v12, %v1649_v63  ;;  %v365_v17 = vpop.f32.mrb[13].mxu0  ;;  %v471_v22 = vmax.f32 %v425_v14, 0.0 }
 0x109   : > { %v366_v20 = vadd.f32 %v1649_v63, %v365_v17  ;;  %v1239_v21 = vpop.f32.mrb[14].mxu0  ;;  %1280 = vmatprep.mubr.bf16.mxu1 %v480_v11  ;;  %v469_v25 = vmax.f32 %v417_v19, 0.0 }
 0x10a   : > { %v377_v23 = vadd.f32 %v1239_v21, %v1649_v63  ;;  %v368_v24 = vpop.f32.mrb[15].mxu0  ;;  %1281 = vmatmul.mubr.bf16.gmra.mrb[24].mxu1 %v481_v8  ;;  %v489_v27 = vpack.c.bf16 %v471_v22, %v470_v13  ;;  %v458_v28 = vmax.f32 %v374_v16, 0.0 }
 0x10b   : > { %v369_v26 = vadd.f32 %v1649_v63, %v368_v24  ;;  %v488_v30 = vpack.c.bf16 %v469_v25, %v468_v18  ;;  %v1254_v31 = vpop.f32.mrb[12].mxu1  ;;  %v456_v32 = vmax.f32 %v366_v20, 0.0 }
 0x10c   : > { %v459_v29 = vmax.f32 %v377_v23, 0.0  ;;  %v438_v35 = vadd.f32 %v1254_v31, %v1649_v63  ;;  %v429_v36 = vpop.f32.mrb[13].mxu1 }
 0x10d   : > { %v457_v33 = vmax.f32 %v369_v26, 0.0  ;;  %v430_v39 = vadd.f32 %v1649_v63, %v429_v36  ;;  %v1255_v40 = vpop.f32.mrb[14].mxu1 }
 0x10e   : > { %v483_v38 = vpack.c.bf16 %v459_v29, %v458_v28  ;;  %v474_v42 = vmax.f32 %v438_v35, 0.0  ;;  %v441_v43 = vadd.f32 %v1255_v40, %v1649_v63  ;;  %v432_v44 = vpop.f32.mrb[15].mxu1 }
 0x10f   : > { %v482_v41 = vpack.c.bf16 %v457_v33, %v456_v32  ;;  %v472_v45 = vmax.f32 %v430_v39, 0.0  ;;  %v433_v46 = vadd.f32 %v1649_v63, %v432_v44  ;;  %v1410_v63 = vld [vmem:[%s1859_s1 + $0x78] sm:$0xff]  }
 0x110   : > { %v475_v47 = vmax.f32 %v441_v43, 0.0  ;;  %1316 = vmatprep.subr.bf16.mxu0 %v1410_v63 }
 0x111   : > { %1284 = vmatprep.mubr.bf16.mxu1 %v482_v41  ;;  %v473_v48 = vmax.f32 %v433_v46, 0.0  ;;  %1317 = vmatpush3.bf16.msra.mxu0 %v1410_v63 }
 0x112   : > { %1285 = vmatmul.mubr.bf16.gmra.mrb[28].mxu1 %v483_v38  ;;  %v491_v49 = vpack.c.bf16 %v475_v47, %v474_v42 }
 0x113   : > { %1288 = vmatprep.mubr.bf16.mxu1 %v1665_v37  ;;  %v490_v50 = vpack.c.bf16 %v473_v48, %v472_v45  ;;  %v1411_v37 = vld [vmem:[%s1859_s1 + $0x80] sm:$0xff]  }
 0x114   : > { %1318 = vmatprep.subr.bf16.mxu0 %v1411_v37 }
 0x115   : > { %1319 = vmatpush3.bf16.msra.mxu0 %v1411_v37 }
 0x11a   : > { %1289 = vmatmul.mubr.bf16.gmra.mrb[32].mxu1 %v1663_v34  ;;  %v1698_v34 = vld [vmem:[%s1860_s2 + $0x1] ss:$0 sm:$0xff] }
 0x11b   : > { %1292 = vmatprep.mubr.bf16.mxu1 %v486_v2 }
 0x122   : > { %1293 = vmatmul.mubr.bf16.gmra.mrb[36].mxu1 %v487_v62 }
 0x123   : > { %1296 = vmatprep.mubr.bf16.mxu1 %v488_v30 }
 0x12a   : > { %1297 = vmatmul.mubr.bf16.gmra.mrb[40].mxu1 %v489_v27 }
 0x12b   : > { %1300 = vmatprep.mubr.bf16.mxu1 %v490_v50 }
 0x132   : > { %1301 = vmatmul.mubr.bf16.gmra.mrb[44].mxu1 %v491_v49 }
 0x1cd   : > { %v1274_v51 = vpop.f32.mrb[16].mxu1 }
 0x1ce   : > { %v604_v52 = vadd.f32 %v1274_v51, %v1698_v34  ;;  %v595_v53 = vpop.f32.mrb[17].mxu1 }
 0x1cf   : > { %v596_v54 = vadd.f32 %v1698_v34, %v595_v53  ;;  %v1275_v55 = vpop.f32.mrb[18].mxu1 }
 0x1d0   : > { %v607_v56 = vadd.f32 %v1275_v55, %v1698_v34  ;;  %v598_v57 = vpop.f32.mrb[19].mxu1  ;;  %v724_v59 = vmax.f32 %v604_v52, 0.0 }
 0x1d1   : > { %v599_v58 = vadd.f32 %v1698_v34, %v598_v57  ;;  %v722_v61 = vmax.f32 %v596_v54, 0.0 }
 0x1d2   : > { %v725_v60 = vmax.f32 %v607_v56, 0.0 }
 0x1d3   : > { %v723_v62 = vmax.f32 %v599_v58, 0.0 }
 0x1d4   : > { %v755_v0 = vpack.c.bf16 %v725_v60, %v724_v59 }
 0x1d5   : > { %v754_v1 = vpack.c.bf16 %v723_v62, %v722_v61  ;;  %v1278_v2 = vpop.f32.mrb[20].mxu1 }
 0x1d6   : > { %v620_v3 = vadd.f32 %v1278_v2, %v1698_v34  ;;  %v611_v4 = vpop.f32.mrb[21].mxu1 }
 0x1d7   : > { %v612_v5 = vadd.f32 %v1698_v34, %v611_v4  ;;  %v1279_v6 = vpop.f32.mrb[22].mxu1  ;;  %1320 = vmatprep.mubr.bf16.mxu0 %v754_v1 }
 0x1d8   : > { %v623_v7 = vadd.f32 %v1279_v6, %v1698_v34  ;;  %v614_v8 = vpop.f32.mrb[23].mxu1  ;;  %1321 = vmatmul.mubr.bf16.vlgmr.msra.gmra.mrb[16].mxu0 %v755_v0  ;;  %v728_v10 = vmax.f32 %v620_v3, 0.0 }
 0x1d9   : > { %v615_v9 = vadd.f32 %v1698_v34, %v614_v8  ;;  %v726_v12 = vmax.f32 %v612_v5, 0.0 }
 0x1da   : > { %v729_v11 = vmax.f32 %v623_v7, 0.0 }
 0x1db   : > { %v727_v13 = vmax.f32 %v615_v9, 0.0 }
 0x1dc   : > { %v757_v14 = vpack.c.bf16 %v729_v11, %v728_v10 }
 0x1dd   : > { %v756_v15 = vpack.c.bf16 %v727_v13, %v726_v12  ;;  %v1282_v16 = vpop.f32.mrb[24].mxu1 }
 0x1de   : > { %v636_v17 = vadd.f32 %v1282_v16, %v1698_v34  ;;  %v627_v18 = vpop.f32.mrb[25].mxu1 }
 0x1df   : > { %v628_v19 = vadd.f32 %v1698_v34, %v627_v18  ;;  %v1283_v20 = vpop.f32.mrb[26].mxu1  ;;  %1324 = vmatprep.mubr.bf16.mxu0 %v756_v15 }
 0x1e0   : > { %v639_v21 = vadd.f32 %v1283_v20, %v1698_v34  ;;  %v630_v22 = vpop.f32.mrb[27].mxu1  ;;  %1325 = vmatmul.mubr.bf16.gmra.mrb[20].mxu0 %v757_v14  ;;  %v732_v24 = vmax.f32 %v636_v17, 0.0 }
 0x1e1   : > { %v631_v23 = vadd.f32 %v1698_v34, %v630_v22  ;;  %v730_v26 = vmax.f32 %v628_v19, 0.0 }
 0x1e2   : > { %v733_v25 = vmax.f32 %v639_v21, 0.0 }
 0x1e3   : > { %v731_v27 = vmax.f32 %v631_v23, 0.0 }
 0x1e4   : > { %v759_v28 = vpack.c.bf16 %v733_v25, %v732_v24 }
 0x1e5   : > { %v758_v29 = vpack.c.bf16 %v731_v27, %v730_v26  ;;  %v1286_v30 = vpop.f32.mrb[28].mxu1 }
 0x1e6   : > { %v652_v31 = vadd.f32 %v1286_v30, %v1698_v34  ;;  %v643_v32 = vpop.f32.mrb[29].mxu1 }
 0x1e7   : > { %v644_v33 = vadd.f32 %v1698_v34, %v643_v32  ;;  %v1287_v35 = vpop.f32.mrb[30].mxu1  ;;  %1328 = vmatprep.mubr.bf16.mxu0 %v758_v29 }
 0x1e8   : > { %v655_v36 = vadd.f32 %v1287_v35, %v1698_v34  ;;  %v646_v38 = vpop.f32.mrb[31].mxu1  ;;  %1329 = vmatmul.mubr.bf16.gmra.mrb[24].mxu0 %v759_v28  ;;  %v736_v40 = vmax.f32 %v652_v31, 0.0 }
 0x1e9   : > { %v647_v39 = vadd.f32 %v1698_v34, %v646_v38  ;;  %v734_v42 = vmax.f32 %v644_v33, 0.0 }
 0x1ea   : > { %v737_v41 = vmax.f32 %v655_v36, 0.0 }
 0x1eb   : > { %v735_v43 = vmax.f32 %v647_v39, 0.0  ;;  %v1738_v39 = vld [vmem:[%s1860_s2 + $0x2] ss:$0 sm:$0xff] }
 0x1ec   : > { %v761_v44 = vpack.c.bf16 %v737_v41, %v736_v40 }
 0x1ed   : > { %v760_v45 = vpack.c.bf16 %v735_v43, %v734_v42  ;;  %v1290_v46 = vpop.f32.mrb[32].mxu1 }
 0x1ee   : > { %v668_v47 = vadd.f32 %v1290_v46, %v1698_v34  ;;  %v659_v48 = vpop.f32.mrb[33].mxu1 }
 0x1ef   : > { %v660_v49 = vadd.f32 %v1698_v34, %v659_v48  ;;  %v1291_v50 = vpop.f32.mrb[34].mxu1  ;;  %1332 = vmatprep.mubr.bf16.mxu0 %v760_v45 }
 0x1f0   : > { %v671_v63 = vadd.f32 %v1291_v50, %v1698_v34  ;;  %v662_v37 = vpop.f32.mrb[35].mxu1  ;;  %1333 = vmatmul.mubr.bf16.gmra.mrb[28].mxu0 %v761_v44  ;;  %v740_v52 = vmax.f32 %v668_v47, 0.0 }
 0x1f1   : > { %v663_v51 = vadd.f32 %v1698_v34, %v662_v37  ;;  %v738_v54 = vmax.f32 %v660_v49, 0.0 }
 0x1f2   : > { %v741_v53 = vmax.f32 %v671_v63, 0.0 }
 0x1f3   : > { %v739_v55 = vmax.f32 %v663_v51, 0.0 }
 0x1f4   : > { %v763_v56 = vpack.c.bf16 %v741_v53, %v740_v52 }
 0x1f5   : > { %v762_v57 = vpack.c.bf16 %v739_v55, %v738_v54  ;;  %v1294_v58 = vpop.f32.mrb[36].mxu1 }
 0x1f6   : > { %v684_v59 = vadd.f32 %v1294_v58, %v1698_v34  ;;  %v675_v60 = vpop.f32.mrb[37].mxu1 }
 0x1f7   : > { %v676_v61 = vadd.f32 %v1698_v34, %v675_v60  ;;  %v1295_v62 = vpop.f32.mrb[38].mxu1  ;;  %1336 = vmatprep.mubr.bf16.mxu0 %v762_v57 }
 0x1f8   : > { %v687_v0 = vadd.f32 %v1295_v62, %v1698_v34  ;;  %v678_v1 = vpop.f32.mrb[39].mxu1  ;;  %1337 = vmatmul.mubr.bf16.gmra.mrb[32].mxu0 %v763_v56  ;;  %v744_v3 = vmax.f32 %v684_v59, 0.0 }
 0x1f9   : > { %v679_v2 = vadd.f32 %v1698_v34, %v678_v1  ;;  %v742_v5 = vmax.f32 %v676_v61, 0.0 }
 0x1fa   : > { %v745_v4 = vmax.f32 %v687_v0, 0.0 }
 0x1fb   : > { %v743_v6 = vmax.f32 %v679_v2, 0.0 }
 0x1fc   : > { %v765_v7 = vpack.c.bf16 %v745_v4, %v744_v3 }
 0x1fd   : > { %v764_v8 = vpack.c.bf16 %v743_v6, %v742_v5  ;;  %v1298_v9 = vpop.f32.mrb[40].mxu1 }
 0x1fe   : > { %v700_v10 = vadd.f32 %v1298_v9, %v1698_v34  ;;  %v691_v11 = vpop.f32.mrb[41].mxu1 }
 0x1ff   : > { %v692_v12 = vadd.f32 %v1698_v34, %v691_v11  ;;  %v1299_v13 = vpop.f32.mrb[42].mxu1  ;;  %1340 = vmatprep.mubr.bf16.mxu0 %v764_v8 }
 0x200   : > { %v703_v14 = vadd.f32 %v1299_v13, %v1698_v34  ;;  %v694_v15 = vpop.f32.mrb[43].mxu1  ;;  %1341 = vmatmul.mubr.bf16.gmra.mrb[36].mxu0 %v765_v7  ;;  %v748_v17 = vmax.f32 %v700_v10, 0.0 }
 0x201   : > { %v695_v16 = vadd.f32 %v1698_v34, %v694_v15  ;;  %v746_v19 = vmax.f32 %v692_v12, 0.0 }
 0x202   : > { %v749_v18 = vmax.f32 %v703_v14, 0.0 }
 0x203   : > { %v747_v20 = vmax.f32 %v695_v16, 0.0 }
 0x204   : > { %v767_v21 = vpack.c.bf16 %v749_v18, %v748_v17 }
 0x205   : > { %v766_v22 = vpack.c.bf16 %v747_v20, %v746_v19  ;;  %v1302_v23 = vpop.f32.mrb[44].mxu1 }
 0x206   : > { %v716_v24 = vadd.f32 %v1302_v23, %v1698_v34  ;;  %v707_v25 = vpop.f32.mrb[45].mxu1 }
 0x207   : > { %v708_v26 = vadd.f32 %v1698_v34, %v707_v25  ;;  %v1303_v27 = vpop.f32.mrb[46].mxu1  ;;  %1344 = vmatprep.mubr.bf16.mxu0 %v766_v22 }
 0x208   : > { %v719_v28 = vadd.f32 %v1303_v27, %v1698_v34  ;;  %v710_v29 = vpop.f32.mrb[47].mxu1  ;;  %1345 = vmatmul.mubr.bf16.gmra.mrb[40].mxu0 %v767_v21  ;;  %v752_v31 = vmax.f32 %v716_v24, 0.0 }
 0x209   : > { %v711_v30 = vadd.f32 %v1698_v34, %v710_v29  ;;  %v750_v33 = vmax.f32 %v708_v26, 0.0 }
 0x20a   : > { %v753_v32 = vmax.f32 %v719_v28, 0.0 }
 0x20b   : > { %v751_v35 = vmax.f32 %v711_v30, 0.0 }
 0x20c   : > { %v769_v36 = vpack.c.bf16 %v753_v32, %v752_v31 }
 0x20d   : > { %v768_v38 = vpack.c.bf16 %v751_v35, %v750_v33 }
 0x20f   : > { %1348 = vmatprep.mubr.bf16.mxu0 %v768_v38 }
 0x210   : > { %1349 = vmatmul.mubr.bf16.gmra.mrb[44].mxu0 %v769_v36 }
 0x2ab   : > { %v1322_v40 = vpop.f32.mrb[16].mxu0 }
 0x2ac   : > { %v882_v41 = vadd.f32 %v1322_v40, %v1738_v39  ;;  %v873_v34 = vpop.f32.mrb[17].mxu0 }
 0x2ad   : > { %v874_v42 = vadd.f32 %v1738_v39, %v873_v34  ;;  %v1323_v43 = vpop.f32.mrb[18].mxu0 }
 0x2ae   : > { %1002 = vst [vmem:[%s1742_s8 + $0x10] sm:$0xff] %v882_v41  ;;  %v885_v44 = vadd.f32 %v1323_v43, %v1738_v39  ;;  %v876_v45 = vpop.f32.mrb[19].mxu0 }
 0x2af   : > { %1000 = vst [vmem:[%s1742_s8] sm:$0xff] %v874_v42  ;;  %v877_v46 = vadd.f32 %v1738_v39, %v876_v45 }
 0x2b0   : > { %1003 = vst [vmem:[%s1742_s8 + $0x18] sm:$0xff] %v885_v44 }
 0x2b1   : > { %1001 = vst [vmem:[%s1742_s8 + $0x8] sm:$0xff] %v877_v46 }
 0x2b3   : > { %v1326_v47 = vpop.f32.mrb[20].mxu0 }
 0x2b4   : > { %v898_v48 = vadd.f32 %v1326_v47, %v1738_v39  ;;  %v889_v49 = vpop.f32.mrb[21].mxu0 }
 0x2b5   : > { %v890_v50 = vadd.f32 %v1738_v39, %v889_v49  ;;  %v1327_v63 = vpop.f32.mrb[22].mxu0 }
 0x2b6   : > { %1006 = vst [vmem:[%s1742_s8 + $0x30] sm:$0xff] %v898_v48  ;;  %v901_v37 = vadd.f32 %v1327_v63, %v1738_v39  ;;  %v892_v51 = vpop.f32.mrb[23].mxu0 }
 0x2b7   : > { %1004 = vst [vmem:[%s1742_s8 + $0x20] sm:$0xff] %v890_v50  ;;  %v893_v52 = vadd.f32 %v1738_v39, %v892_v51 }
 0x2b8   : > { %1007 = vst [vmem:[%s1742_s8 + $0x38] sm:$0xff] %v901_v37 }
 0x2b9   : > { %1005 = vst [vmem:[%s1742_s8 + $0x28] sm:$0xff] %v893_v52 }
 0x2bb   : > { %v1330_v53 = vpop.f32.mrb[24].mxu0 }
 0x2bc   : > { %v914_v54 = vadd.f32 %v1330_v53, %v1738_v39  ;;  %v905_v55 = vpop.f32.mrb[25].mxu0 }
 0x2bd   : > { %v906_v56 = vadd.f32 %v1738_v39, %v905_v55  ;;  %v1331_v57 = vpop.f32.mrb[26].mxu0 }
 0x2be   : > { %1010 = vst [vmem:[%s1742_s8 + $0x50] sm:$0xff] %v914_v54  ;;  %v917_v58 = vadd.f32 %v1331_v57, %v1738_v39  ;;  %v908_v59 = vpop.f32.mrb[27].mxu0 }
 0x2bf   : > { %1008 = vst [vmem:[%s1742_s8 + $0x40] sm:$0xff] %v906_v56  ;;  %v909_v60 = vadd.f32 %v1738_v39, %v908_v59 }
 0x2c0   : > { %1011 = vst [vmem:[%s1742_s8 + $0x58] sm:$0xff] %v917_v58 }
 0x2c1   : > { %1009 = vst [vmem:[%s1742_s8 + $0x48] sm:$0xff] %v909_v60 }
 0x2c3   : > { %v1334_v61 = vpop.f32.mrb[28].mxu0 }
 0x2c4   : > { %v930_v62 = vadd.f32 %v1334_v61, %v1738_v39  ;;  %v921_v0 = vpop.f32.mrb[29].mxu0 }
 0x2c5   : > { %v922_v1 = vadd.f32 %v1738_v39, %v921_v0  ;;  %v1335_v2 = vpop.f32.mrb[30].mxu0 }
 0x2c6   : > { %1014 = vst [vmem:[%s1742_s8 + $0x70] sm:$0xff] %v930_v62  ;;  %v933_v3 = vadd.f32 %v1335_v2, %v1738_v39  ;;  %v924_v4 = vpop.f32.mrb[31].mxu0 }
 0x2c7   : > { %1012 = vst [vmem:[%s1742_s8 + $0x60] sm:$0xff] %v922_v1  ;;  %v925_v5 = vadd.f32 %v1738_v39, %v924_v4 }
 0x2c8   : > { %1015 = vst [vmem:[%s1742_s8 + $0x78] sm:$0xff] %v933_v3 }
 0x2c9   : > { %1013 = vst [vmem:[%s1742_s8 + $0x68] sm:$0xff] %v925_v5 }
 0x2cb   : > { %v1338_v6 = vpop.f32.mrb[32].mxu0 }
 0x2cc   : > { %v946_v7 = vadd.f32 %v1338_v6, %v1738_v39  ;;  %v937_v8 = vpop.f32.mrb[33].mxu0 }
 0x2cd   : > { %v938_v9 = vadd.f32 %v1738_v39, %v937_v8  ;;  %v1339_v10 = vpop.f32.mrb[34].mxu0 }
 0x2ce   : > { %1018 = vst [vmem:[%s1742_s8 + $0x90] sm:$0xff] %v946_v7  ;;  %v949_v11 = vadd.f32 %v1339_v10, %v1738_v39  ;;  %v940_v12 = vpop.f32.mrb[35].mxu0 }
 0x2cf   : > { %1016 = vst [vmem:[%s1742_s8 + $0x80] sm:$0xff] %v938_v9  ;;  %v941_v13 = vadd.f32 %v1738_v39, %v940_v12 }
 0x2d0   : > { %1019 = vst [vmem:[%s1742_s8 + $0x98] sm:$0xff] %v949_v11 }
 0x2d1   : > { %1017 = vst [vmem:[%s1742_s8 + $0x88] sm:$0xff] %v941_v13 }
 0x2d3   : > { %v1342_v14 = vpop.f32.mrb[36].mxu0 }
 0x2d4   : > { %v962_v15 = vadd.f32 %v1342_v14, %v1738_v39  ;;  %v953_v16 = vpop.f32.mrb[37].mxu0 }
 0x2d5   : > { %v954_v17 = vadd.f32 %v1738_v39, %v953_v16  ;;  %v1343_v18 = vpop.f32.mrb[38].mxu0 }
 0x2d6   : > { %1022 = vst [vmem:[%s1742_s8 + $0xb0] sm:$0xff] %v962_v15  ;;  %v965_v19 = vadd.f32 %v1343_v18, %v1738_v39  ;;  %v956_v20 = vpop.f32.mrb[39].mxu0 }
 0x2d7   : > { %1020 = vst [vmem:[%s1742_s8 + $0xa0] sm:$0xff] %v954_v17  ;;  %v957_v21 = vadd.f32 %v1738_v39, %v956_v20 }
 0x2d8   : > { %1023 = vst [vmem:[%s1742_s8 + $0xb8] sm:$0xff] %v965_v19 }
 0x2d9   : > { %1021 = vst [vmem:[%s1742_s8 + $0xa8] sm:$0xff] %v957_v21 }
 0x2db   : > { %v1346_v22 = vpop.f32.mrb[40].mxu0 }
 0x2dc   : > { %v978_v23 = vadd.f32 %v1346_v22, %v1738_v39  ;;  %v969_v24 = vpop.f32.mrb[41].mxu0 }
 0x2dd   : > { %v970_v25 = vadd.f32 %v1738_v39, %v969_v24  ;;  %v1347_v26 = vpop.f32.mrb[42].mxu0 }
 0x2de   : > { %1026 = vst [vmem:[%s1742_s8 + $0xd0] sm:$0xff] %v978_v23  ;;  %v981_v27 = vadd.f32 %v1347_v26, %v1738_v39  ;;  %v972_v28 = vpop.f32.mrb[43].mxu0 }
 0x2df   : > { %1024 = vst [vmem:[%s1742_s8 + $0xc0] sm:$0xff] %v970_v25  ;;  %v973_v29 = vadd.f32 %v1738_v39, %v972_v28 }
 0x2e0   : > { %1027 = vst [vmem:[%s1742_s8 + $0xd8] sm:$0xff] %v981_v27 }
 0x2e1   : > { %1025 = vst [vmem:[%s1742_s8 + $0xc8] sm:$0xff] %v973_v29 }
 0x2e3   : > { %v1350_v30 = vpop.f32.mrb[44].mxu0 }
 0x2e4   : > { %v994_v31 = vadd.f32 %v1350_v30, %v1738_v39  ;;  %v985_v32 = vpop.f32.mrb[45].mxu0 }
 0x2e5   : > { %v986_v33 = vadd.f32 %v1738_v39, %v985_v32  ;;  %v1351_v35 = vpop.f32.mrb[46].mxu0 }
 0x2e6   : > { %1030 = vst [vmem:[%s1742_s8 + $0xf0] sm:$0xff] %v994_v31  ;;  %v997_v36 = vadd.f32 %v1351_v35, %v1738_v39  ;;  %v988_v38 = vpop.f32.mrb[47].mxu0 }
 0x2e7   : > { %1028 = vst [vmem:[%s1742_s8 + $0xe0] sm:$0xff] %v986_v33  ;;  %v989_v40 = vadd.f32 %v1738_v39, %v988_v38 }
 0x2e8   : > { %1031 = vst [vmem:[%s1742_s8 + $0xf8] sm:$0xff] %v997_v36 }
 0x2e9   : > { %1029 = vst [vmem:[%s1742_s8 + $0xe8] sm:$0xff] %v989_v40 }
 0x2ea   : > { %1425 = shalt.err (!%p1422_p3)
}
 0x2eb   : > { %s1426_s27 = scalar_lea.hbm %s1807_s19, 4096  ;;  %s1430_s30 = scalar_lea.hbm %s1861_s3, 8192 }
 0x2ec   : > { %p1427_p4 = scmp.ne.s32.totalorder %s1807_s19, %s1426_s27  ;;  %p1431_p9 = scmp.lt.u32.totalorder %s1807_s19, %s1861_s3 }
 0x2ed   : > { %p1432_p10 = scmp.lt.u32.totalorder %s1430_s30, %s1426_s27  ;;  %p1434_p12 = scmp.lt.u32.totalorder %s1426_s27, %s1807_s19 }
 0x2ee   : > { %p1428_p7 = pnand %p1427_p4, %p1537_p5 }
 0x2ef   : > { %p1433_p11 = por %p1432_p10, %p1431_p9 }
 0x2f0   : > { %p1429_p8 = pneg %p1428_p7 }
 0x2f1   : > { %p1435_p13 = por %p1434_p12, %p1433_p11 }
 0x2f3   : > { %p1436_p0 = pnand %p1435_p13, %p1429_p8 }
 0x2f5   : > { %1439 = shalt.err (!%p1436_p0)
}
 0x2f6   : > { %s1477_s6 = smov 128   ;;  %s1478_s7 = smov 8  }
 0x2f7   : > { %1354 = dma.vmem_to_hbm [thread:$0]  (%p1537_p5), %s1809_s10, 4096, %s1807_s19, %s1817_s16, %s1477_s6, %s1477_s6, %s1478_s7  }
 0x2f8 PF: > { %p1360_p1 = scmp.ge.s32.totalorder %s1474_s15, 2  ;;  %s1061_s8 = sand.u32 1, %s1462_s12  }
 0x2f9   : > { %s1062_s9 = scalar_lea.sflag [#allocation3], %s1061_s8 }
 0x2fa   : > { %p1357_p2 = pnand %p1360_p1, %p1541_p6 }
 0x2fc   : > { %1457 = dma.done.wait (!%p1357_p2), %s1062_s9, 4096  }
 0x2fd   : > { %1459 = vsyncadd (!%p1357_p2), %s1062_s9, 4294963200  ;;  %p13_p3 = scmp.ge.s32.totalorder %s1524_s18, 4   ;;  %s1864_s12 = smov %s1466_s13 }
 0x2fe   : > { %s1865_s13 = smov %s1470_s14  ;;  %s1866_s14 = smov %s1535_s21 }
 0x2ff   : > { %s1867_s15 = smov %s1524_s18  ;;  %15 = sbr.rel (!%p13_p3) target bundleno = 3 (0x3), region = 67 }
 0x306   :  { %1067 = vsyncpa [#allocation3], 1 }
 0x307   :  { %1069 = vsyncpa [#allocation3 + $0x1], 1 }

</bundles_post_ra>
